<compile_context>
chip_gen: v7x
topology: tpu7x:2x2x1
jax: 0.10.0
libtpu: 0.0.40
codegen_flags: <defaults>
</compile_context>

<pallas_src>
import functools

import jax
import jax.numpy as jnp
from jax import lax
from jax.experimental import pallas as pl
from jax.experimental.pallas import tpu as pltpu

_LANES = 128
_NUM_CORES = 2   # leading "parallel" grid axis; v7x has 2 TensorCores per chip


def _focal_loss_kernel(pred_ref, sel_ref, out_ref, acc_ref,
                       *, gamma, eps, rows_valid, tile_rows):
    core = pl.program_id(0)
    step = pl.program_id(1)
    steps = pl.num_programs(1)

    @pl.when(step == 0)
    def _init():
        acc_ref[...] = jnp.zeros_like(acc_ref)

    # Un-clamped logical block id (the index_map clamps to stay in bounds; the
    # row-validity mask below zeroes the duplicated / out-of-range rows).
    blk = core * steps + step
    row0 = blk * tile_rows

    p = pred_ref[...].astype(jnp.float32)                    # (tile_rows, 128)
    selected = sel_ref[...] != 0                              # one-hot lanes

    rows = lax.broadcasted_iota(jnp.int32, p.shape, 0) + row0
    take = jnp.logical_and(selected, rows < rows_valid)

    # Clip only matters where selected; everywhere else select the neutral 1.0
    # (log(1)=0, (1-1)^gamma=0) so stale / padded lanes contribute exactly 0.
    p_t = jnp.where(take, jnp.clip(p, eps, 1.0 - eps), 1.0)

    if gamma == 1.0:
        w = 1.0 - p_t
    elif float(gamma).is_integer():
        w = lax.integer_pow(1.0 - p_t, int(gamma))            # VPU only
    else:
        w = jnp.exp(gamma * jnp.log1p(-p_t))                  # EUP path

    acc_ref[...] += -jnp.log(p_t) * w

    @pl.when(step == steps - 1)
    def _finalize():
        total = jnp.sum(acc_ref[...], axis=0, keepdims=True)  # (1, 128)
        total = jnp.sum(total, axis=1, keepdims=True)         # (1, 1)
        out_ref[...] = jnp.broadcast_to(total, out_ref.shape)


def focal_loss(pred, target, num_classes, gamma=1.0, eps=1e-7,
               tile_rows=None, pred_bytes_per_step=2 * 1024 * 1024):
    """Pallas FocalLoss forward. pred: (N, C) float probs, target: (N,) int."""
    n, c = pred.shape
    assert c == num_classes

    # Lane-dense one-hot selection mask (uint8). Out-of-range labels -> all 0.
    sel = (target.reshape(n, 1).astype(jnp.int32)
           == jnp.arange(c, dtype=jnp.int32)[None, :]).astype(jnp.uint8)

    flat = n * c
    rows = pl.cdiv(flat, _LANES)
    rows = max(rows, 8)                       # at least one 8-sublane tile
    pad = rows * _LANES - flat

    pred_flat = pred.reshape(flat)
    sel_flat = sel.reshape(flat)
    if pad:
        pred_flat = jnp.pad(pred_flat, (0, pad))
        sel_flat = jnp.pad(sel_flat, (0, pad))   # zero mask => contributes 0
    pred2d = pred_flat.reshape(rows, _LANES)
    sel2d = sel_flat.reshape(rows, _LANES)

    # Tile rows sized so each grid step moves ~pred_bytes_per_step of pred
    # (multiple of 32 so f32/bf16/int8 blocks all pack cleanly).
    if tile_rows is None:
        tile_rows = pred_bytes_per_step // (_LANES * pred.dtype.itemsize)
    tile_rows = max(32, (int(tile_rows) // 32) * 32)
    if tile_rows >= rows:
        tile_rows = rows                      # single full-dim block per core pass

    n_blocks = pl.cdiv(rows, tile_rows)
    steps = pl.cdiv(n_blocks, _NUM_CORES)     # grid steps per core

    def in_map(core, step):
        # Clamp so the DMA never walks past the last block; the duplicated
        # block is fully masked out inside the kernel via its un-clamped id.
        return (jnp.minimum(core * steps + step, n_blocks - 1), 0)

    kernel = functools.partial(
        _focal_loss_kernel,
        gamma=float(gamma), eps=float(eps),
        rows_valid=rows, tile_rows=tile_rows,
    )

    out = pl.pallas_call(
        kernel,
        out_shape=jax.ShapeDtypeStruct((_NUM_CORES * 8, _LANES), jnp.float32),
        grid=(_NUM_CORES, steps),
        in_specs=[
            pl.BlockSpec((tile_rows, _LANES), in_map),   # pred (lane-dense)
            pl.BlockSpec((tile_rows, _LANES), in_map),   # one-hot mask (uint8)
        ],
        out_specs=pl.BlockSpec((8, _LANES), lambda core, step: (core, 0)),
        scratch_shapes=[pltpu.VMEM((tile_rows, _LANES), jnp.float32)],
        compiler_params=pltpu.CompilerParams(
            dimension_semantics=("parallel", "arbitrary"),
            vmem_limit_bytes=32 * 1024 * 1024,
        ),
    )(pred2d, sel2d)

    # Per-core partial sums -> mean over the true batch size.
    return jnp.sum(out[::8, 0]) / jnp.float32(n)


def _focal_loss_ref(pred, target, num_classes, gamma=1.0, eps=1e-7):
    """Pure-JAX reference mirroring the PyTorch module."""
    pred = pred.astype(jnp.float32)
    logit = jnp.clip(pred, eps, 1.0 - eps)
    y = jax.nn.one_hot(target, num_classes, dtype=jnp.float32)
    loss = -1.0 * y * jnp.log(logit) * (1.0 - logit) ** gamma
    return loss.sum(axis=1).mean()


if __name__ == "__main__":
    key = jax.random.PRNGKey(0)
    k1, k2, k3, k4, k5, k6 = jax.random.split(key, 6)

    # Case 1: aligned (N*C % 128 == 0), integer gamma, single block per core
    # (the second core's clamped duplicate pass is fully masked).
    N1, C1 = 96, 16
    p1 = jax.nn.softmax(jax.random.normal(k1, (N1, C1), jnp.float32), -1)
    t1 = jax.random.randint(k2, (N1,), 0, C1, dtype=jnp.int32)
    o1 = jax.block_until_ready(focal_loss(p1, t1, C1, gamma=2.0))
    r1 = _focal_loss_ref(p1, t1, C1, gamma=2.0)
    assert jnp.allclose(o1, r1, rtol=1e-5, atol=1e-6), (o1, r1)

    # Case 2: unaligned tail (needs zero padding), gamma == 1, forced small
    # tile so each core runs multiple steps and the last block is partial.
    N2, C2 = 1000, 10
    p2 = jax.nn.softmax(jax.random.normal(k3, (N2, C2), jnp.float32), -1)
    t2 = jax.random.randint(k4, (N2,), 0, C2, dtype=jnp.int32)
    o2 = jax.block_until_ready(focal_loss(p2, t2, C2, gamma=1.0, tile_rows=32))
    r2 = _focal_loss_ref(p2, t2, C2, gamma=1.0)
    assert jnp.allclose(o2, r2, rtol=1e-5, atol=1e-6), (o2, r2)

    # Case 3: bf16 input, non-integer gamma (exp/log1p path).
    N3, C3 = 256, 8
    p3 = jax.nn.softmax(jax.random.normal(k5, (N3, C3), jnp.float32),
                        -1).astype(jnp.bfloat16)
    t3 = jax.random.randint(k6, (N3,), 0, C3, dtype=jnp.int32)
    o3 = jax.block_until_ready(focal_loss(p3, t3, C3, gamma=1.5))
    r3 = _focal_loss_ref(p3, t3, C3, gamma=1.5)
    assert jnp.allclose(o3, r3, rtol=1e-4, atol=1e-5), (o3, r3)

    print("KERNEL_OK")
</pallas_src>

<mosaic_0001>
module attributes {stable_mosaic.version = 11 : i64} {
  func.func @_focal_loss_kernel(%arg0: i32, %arg1: i32, %arg2: memref<12x128xf32, #tpu.memory_space<vmem>>, %arg3: memref<12x128xi8, #tpu.memory_space<vmem>>, %arg4: memref<8x128xf32, #tpu.memory_space<vmem>>, %arg5: memref<12x128xf32, #tpu.memory_space<vmem>>) attributes {dimension_semantics = [#tpu.dimension_semantics<parallel>, #tpu.dimension_semantics<arbitrary>], iteration_bounds = array<i64: 2, 1>, scalar_prefetch = 0 : i64, scratch_operands = 1 : i64, tpu.core_type = #tpu.core_type<tc>, window_params = [{transform_indices = @transform_0, window_bounds = array<i64: 12, 128>}, {transform_indices = @transform_1, window_bounds = array<i64: 12, 128>}, {transform_indices = @transform_2, window_bounds = array<i64: 8, 128>}]} {
    %c0_i32 = arith.constant 0 : i32
    %0 = arith.cmpi eq, %arg1, %c0_i32 : i32
    %1 = arith.extui %0 : i1 to i32
    %c0_i32_0 = arith.constant 0 : i32
    %2 = arith.cmpi ne, %1, %c0_i32_0 : i32
    scf.if %2 {
      %cst_15 = arith.constant 0.000000e+00 : f32
      %35 = vector.broadcast %cst_15 : f32 to vector<12x128xf32>
      %c0_16 = arith.constant 0 : index
      %c0_17 = arith.constant 0 : index
      %36 = vector.load %arg5[%c0_16, %c0_17] : memref<12x128xf32, #tpu.memory_space<vmem>>, vector<12x128xf32>
      tpu.vector_store %arg5[%c0_16, %c0_17], %35 {strides = array<i32>} : memref<12x128xf32, #tpu.memory_space<vmem>>, vector<12x128xf32>,
    } else {
    }
    %c1_i32 = arith.constant 1 : i32
    %3 = arith.muli %arg0, %c1_i32 : i32
    %4 = arith.addi %3, %arg1 : i32
    %c12_i32 = arith.constant 12 : i32
    %5 = arith.muli %4, %c12_i32 : i32
    %c0 = arith.constant 0 : index
    %c0_1 = arith.constant 0 : index
    %6 = vector.load %arg2[%c0, %c0_1] : memref<12x128xf32, #tpu.memory_space<vmem>>, vector<12x128xf32>
    %c0_2 = arith.constant 0 : index
    %c0_3 = arith.constant 0 : index
    %7 = vector.load %arg3[%c0_2, %c0_3] : memref<12x128xi8, #tpu.memory_space<vmem>>, vector<12x128xi8>
    %c0_i8 = arith.constant 0 : i8
    %8 = vector.broadcast %c0_i8 : i8 to vector<12x128xi8>
    %9 = arith.cmpi ne, %7, %8 : vector<12x128xi8>
    %10 = tpu.iota {dimensions = array<i32: 0>} : vector<12x128xi32>
    %11 = vector.broadcast %5 : i32 to vector<12x128xi32>
    %12 = arith.addi %10, %11 : vector<12x128xi32>
    %c12_i32_4 = arith.constant 12 : i32
    %13 = vector.broadcast %c12_i32_4 : i32 to vector<12x128xi32>
    %14 = arith.cmpi slt, %12, %13 : vector<12x128xi32>
    %15 = arith.andi %9, %14 : vector<12x128xi1>
    %cst = arith.constant 1.000000e-07 : f32
    %cst_5 = arith.constant 0.99999988 : f32
    %16 = vector.broadcast %cst : f32 to vector<12x128xf32>
    %17 = arith.maximumf %16, %6 : vector<12x128xf32>
    %18 = vector.broadcast %cst_5 : f32 to vector<12x128xf32>
    %19 = arith.minimumf %18, %17 : vector<12x128xf32>
    %cst_6 = arith.constant 1.000000e+00 : f32
    %20 = vector.broadcast %cst_6 : f32 to vector<12x128xf32>
    %21 = arith.select %15, %19, %20 : vector<12x128xi1>, vector<12x128xf32>
    %cst_7 = arith.constant 1.000000e+00 : f32
    %22 = vector.broadcast %cst_7 : f32 to vector<12x128xf32>
    %23 = arith.subf %22, %21 : vector<12x128xf32>
    %24 = arith.mulf %23, %23 : vector<12x128xf32>
    %c0_8 = arith.constant 0 : index
    %c0_9 = arith.constant 0 : index
    %25 = vector.load %arg5[%c0_8, %c0_9] : memref<12x128xf32, #tpu.memory_space<vmem>>, vector<12x128xf32>
    %26 = math.log %21 : vector<12x128xf32>
    %cst_10 = arith.constant 0.000000e+00 : f32
    %27 = vector.broadcast %cst_10 : f32 to vector<12x128xf32>
    %28 = arith.subf %27, %26 : vector<12x128xf32>
    %29 = arith.mulf %28, %24 : vector<12x128xf32>
    %30 = arith.addf %25, %29 : vector<12x128xf32>
    %c0_11 = arith.constant 0 : index
    %c0_12 = arith.constant 0 : index
    %31 = vector.load %arg5[%c0_11, %c0_12] : memref<12x128xf32, #tpu.memory_space<vmem>>, vector<12x128xf32>
    tpu.vector_store %arg5[%c0_11, %c0_12], %30 {strides = array<i32>} : memref<12x128xf32, #tpu.memory_space<vmem>>, vector<12x128xf32>,
    %c0_i32_13 = arith.constant 0 : i32
    %32 = arith.cmpi eq, %arg1, %c0_i32_13 : i32
    %33 = arith.extui %32 : i1 to i32
    %c0_i32_14 = arith.constant 0 : i32
    %34 = arith.cmpi ne, %33, %c0_i32_14 : i32
    scf.if %34 {
      %c0_15 = arith.constant 0 : index
      %c0_16 = arith.constant 0 : index
      %35 = vector.load %arg5[%c0_15, %c0_16] : memref<12x128xf32, #tpu.memory_space<vmem>>, vector<12x128xf32>
      %cst_17 = arith.constant dense<0.000000e+00> : vector<128xf32>
      %36 = vector.multi_reduction <add>, %35, %cst_17 [0] : vector<12x128xf32> to vector<128xf32>
      %37 = vector.shape_cast %36 : vector<128xf32> to vector<1x128xf32>
      %cst_18 = arith.constant dense<0.000000e+00> : vector<1xf32>
      %38 = vector.multi_reduction <add>, %37, %cst_18 [1] : vector<1x128xf32> to vector<1xf32>
      %39 = vector.shape_cast %38 : vector<1xf32> to vector<1x1xf32>
      %40 = vector.shape_cast %39 : vector<1x1xf32> to vector<1x1xf32>
      %41 = vector.broadcast %40 : vector<1x1xf32> to vector<8x128xf32>
      %c0_19 = arith.constant 0 : index
      %c0_20 = arith.constant 0 : index
      %42 = vector.load %arg4[%c0_19, %c0_20] : memref<8x128xf32, #tpu.memory_space<vmem>>, vector<8x128xf32>
      tpu.vector_store %arg4[%c0_19, %c0_20], %41 {strides = array<i32>} : memref<8x128xf32, #tpu.memory_space<vmem>>, vector<8x128xf32>,
    } else {
    }
    return
  }
  func.func @transform_0(%arg0: i32, %arg1: i32) -> (i32, i32) {
    %c1_i32 = arith.constant 1 : i32
    %0 = arith.muli %arg0, %c1_i32 : i32
    %1 = arith.addi %0, %arg1 : i32
    %c0_i32 = arith.constant 0 : i32
    %2 = arith.minsi %1, %c0_i32 : i32
    %c0_i32_0 = arith.constant 0 : i32
    %c0_i32_1 = arith.constant 0 : i32
    return %2, %c0_i32_0 : i32, i32
  }
  func.func @transform_1(%arg0: i32, %arg1: i32) -> (i32, i32) {
    %c1_i32 = arith.constant 1 : i32
    %0 = arith.muli %arg0, %c1_i32 : i32
    %1 = arith.addi %0, %arg1 : i32
    %c0_i32 = arith.constant 0 : i32
    %2 = arith.minsi %1, %c0_i32 : i32
    %c0_i32_0 = arith.constant 0 : i32
    %c0_i32_1 = arith.constant 0 : i32
    return %2, %c0_i32_0 : i32, i32
  }
  func.func @transform_2(%arg0: i32, %arg1: i32) -> (i32, i32) {
    %c0_i32 = arith.constant 0 : i32
    %c0_i32_0 = arith.constant 0 : i32
    return %arg0, %c0_i32 : i32, i32
  }
}

</mosaic_0001>

<bundles_post_ra>
// kernel: tpu_custom_call.1
= control target key start
LH: loop header
LB: loop body
LE: loop exit
PB: predicated region body
PF: predicated region fallthrough
CT: control target
= control target key end

     0   :  { %7 = vsyncpa [#allocation4], 0  ;;  %s944_s0 = inlined_call_operand.hbm [shape: f32[12,128], index: 0, kind: input, shape index: {}]   ;;  %s945_s1 = inlined_call_operand.hbm [shape: u8[12,128], index: 1, kind: input, shape index: {}]   ;;  %s946_s2 = inlined_call_operand.hbm [shape: f32[16,128], index: 2, kind: output, shape index: {}]  }
   0x1   :  { %9 = vsyncpa [#allocation4 + $0x1], 0 }
   0x2   :  { %10 = vsyncpa [#allocation7], 0 }
   0x3   :  { %12 = vsyncpa [#allocation7 + $0x1], 0 }
   0x4   :  { %13 = vsyncpa [#allocation5], 0 }
   0x5   :  { %15 = vsyncpa [#allocation5 + $0x1], 0  ;;  %s746_s9 = smov 0   ;;  %s748_s10 = smov 0  }
   0x6   :  { %s750_s11 = smov 0   ;;  %s752_s12 = smov 0  }
   0x7   :  { %s754_s13 = smov 0   ;;  %s756_s14 = smov 0  }
   0x8   :  { %s758_s15 = smov 0   ;;  %s760_s16 = smov 0  }
   0x9 LB: > { %s432_s17 = sadd.s32 4294967295, %s720_s16   ;;  %s433_s18 = sadd.s32 4294967294, %s720_s16   ;;  %s720_s16 = sphi %s760_s16, %s21_s16   ;;  %s716_s15 = sphi %s758_s15, %s965_s15   ;;  %s712_s14 = sphi %s756_s14, %s964_s14   ;;  %s708_s13 = sphi %s754_s13, %s934_s13   ;;  %s704_s12 = sphi %s752_s12, %s963_s12   ;;  %s700_s11 = sphi %s750_s11, %s962_s11   ;;  %s696_s10 = sphi %s748_s10, %s961_s10   ;;  %s692_s9 = sphi %s746_s9, %s960_s9  }
   0xa   : > { %s33_s19 = sadd.s32 1, %s716_s15  ;;  %p689_p1 = scmp.ne.s32.totalorder %s708_s13, 0 }
   0xb   : > { %p35_p0 = scmp.ge.s32.totalorder %s33_s19, 2  ;;  %p54_p2 = scmp.eq.s32.totalorder %s720_s16, 0 }
   0xc   : > { %p59_p3 = scmp.ne.s32.totalorder %s708_s13, %s704_s12  ;;  %p60_p5 = scmp.eq.s32.totalorder %s432_s17, 0 }
   0xd   : > { %s967_s19 = smov (%p35_p0, %s33_s19), 0  ;;  %p792_p4 = por %p689_p1, %p54_p2 }
   0xe   : > { %p796_p6 = por %p60_p5, %p59_p3  ;;  %s101_s22 = ssub.s32 %s716_s15, %s967_s19 }
   0xf   : > { %p102_p7 = scmp.eq.s32.totalorder %s101_s22, 0  ;;  %s104_s23 = sadd.s32 1, %s700_s11 }
  0x10   : > { %s950_s21 = scalar_select %p796_p6, 1, 0 }
  0x11   : > { %s804_s24 = scalar_select %p102_p7, %s700_s11, %s104_s23  }
  0x12   : > { %p114_p8 = scmp.ne.s32.totalorder %s700_s11, %s696_s10  ;;  %p115_p9 = scmp.eq.s32.totalorder %s432_s17, 1 }
  0x13   : > { %p120_p10 = scmp.ne.s32.totalorder %s696_s10, %s692_s9  ;;  %p121_p11 = scmp.eq.s32.totalorder %s433_s18, 1 }
  0x14   : > { %p810_p12 = por %p115_p9, %p114_p8  ;;  %p469_p1 = scmp.lt.s32.totalorder %s720_s16, 2 }
  0x15   : > { %p815_p0 = por %p121_p11, %p120_p10  ;;  %s722_s27 = smov [#allocation3]  }
  0x16   : > { %s951_s25 = scalar_select %p810_p12, 1, 0 }
  0x17   : > { %s952_s26 = scalar_select %p815_p0, 1, 0 }
  0x18   : > { %s155_s28 = sshll.u32 %s722_s27, 4  ;;  %p822_p2 = pnand %p469_p1, %p792_p4  ;;  %s156_s28 = int_to_ptr.vmem [resolvable:$true] %s155_s28 }
  0x19   : > { %s553_s4 = scalar_lea.hbm %s944_s0, 256 }
  0x1a   : > { %p554_p3 = scmp.ne.s32.totalorder %s944_s0, %s553_s4  ;;  %p555_p5 = pneg %p822_p2 }
  0x1b   : > { %p560_p8 = scmp.lt.u32.totalorder %s553_s4, %s553_s4  ;;  %p562_p9 = scmp.lt.u32.totalorder %s553_s4, %s944_s0 }
  0x1c   : > { %p556_p7 = pnand %p555_p5, %p554_p3 }
  0x1d   : > { %p563_p10 = por %p562_p9, %p560_p8 }
  0x1e   : > { %p557_p4 = pneg %p556_p7 }
  0x20   : > { %p564_p11 = pnand %p563_p10, %p557_p4 }
  0x22   : > { %567 = shalt.err (!%p564_p11)
}
  0x23   : > { %s568_s12 = scalar_lea.vmem %s156_s28, 256  ;;  %s575_s17 = scalar_lea.vmem %s156_s28, 512 }
  0x24   : > { %p569_p1 = scmp.ne.s32.totalorder %s156_s28, %s568_s12  ;;  %p576_p12 = scmp.lt.s32.totalorder %s156_s28, %s156_s28 }
  0x25   : > { %p577_p6 = scmp.lt.s32.totalorder %s575_s17, %s568_s12 }
  0x26   : > { %p571_p13 = pnand %p569_p1, %p555_p5 }
  0x27   : > { %p578_p3 = por %p577_p6, %p576_p12 }
  0x28   : > { %p572_p0 = pneg %p571_p13 }
  0x2a   : > { %p579_p7 = pnand %p578_p3, %p572_p0 }
  0x2c   : > { %582 = shalt.err (!%p579_p7)
}
  0x2d   : > { %s723_s18 = smov 128   ;;  %s724_s20 = smov 8  }
  0x2e   : > { %461 = dma.hbm_to_vmem [thread:$0]  (!%p822_p2), %s944_s0, 256, %s156_s28, [#allocation4], %s723_s18, %s723_s18, %s724_s20  }
  0x2f   : > { %p442_p4 = scmp.ge.s32.totalorder %s720_s16, 1  ;;  %p187_p8 = scmp.lt.s32.totalorder %s720_s16, 3 }
  0x30   : > { %s725_s30 = smov [#allocation6]   ;;  %s583_s6 = scalar_lea.hbm %s945_s1, 64 }
  0x31   : > { %p850_p13 = pnand %p442_p4, %p187_p8  ;;  %s179_s3 = sshll.u32 %s725_s30, 4  ;;  %s180_s3 = int_to_ptr.vmem [resolvable:$true] %s179_s3 }
  0x32   : > { %p584_p6 = scmp.ne.s32.totalorder %s945_s1, %s583_s6  ;;  %p590_p9 = scmp.lt.u32.totalorder %s583_s6, %s583_s6 }
  0x33   : > { %s954_s27 = scalar_select %p850_p13, 1, 0 }
  0x34   : > { %p586_p12 = pnand %p584_p6, %p555_p5  ;;  %p592_p10 = scmp.lt.u32.totalorder %s583_s6, %s945_s1 }
  0x36   : > { %p587_p0 = pneg %p586_p12  ;;  %p593_p11 = por %p592_p10, %p590_p9 }
  0x38   : > { %p594_p1 = pnand %p593_p11, %p587_p0 }
  0x3a   : > { %597 = shalt.err (!%p594_p1)
}
  0x3b   : > { %s598_s17 = scalar_lea.vmem %s180_s3, 64  ;;  %s605_s18 = scalar_lea.vmem %s180_s3, 128 }
  0x3c   : > { %p599_p3 = scmp.ne.s32.totalorder %s180_s3, %s598_s17  ;;  %p606_p8 = scmp.lt.s32.totalorder %s180_s3, %s180_s3 }
  0x3d   : > { %p607_p13 = scmp.lt.s32.totalorder %s605_s18, %s598_s17 }
  0x3e   : > { %p601_p7 = pnand %p599_p3, %p555_p5 }
  0x3f   : > { %p608_p6 = por %p607_p13, %p606_p8 }
  0x40   : > { %p602_p4 = pneg %p601_p7 }
  0x42   : > { %p609_p12 = pnand %p608_p6, %p602_p4 }
  0x44   : > { %612 = shalt.err (!%p609_p12)
}
  0x45   : > { %s726_s20 = smov 32   ;;  %s727_s22 = smov 2  }
  0x46   : > { %464 = dma.hbm_to_vmem [thread:$0]  (!%p822_p2), %s945_s1, 64, %s180_s3, [#allocation7], %s726_s20, %s726_s20, %s727_s22  }
  0x47   : > { %p955_p0 = scmp.ne.s32.totalorder %s954_s27, 0 }
  0x48   : > { %s193_s4 = sand.u32 (!%p955_p0), 1, %s708_s13   ;;  %p956_p5 = scmp.ne.s32.totalorder (!%p955_p0), %s950_s21, 0 }
  0x49   : > { %191 = sbr.rel (%p955_p0) target bundleno = 300 (0x12c), region = 28  ;;  %s443_s5 = sshll.u32 (!%p955_p0), %s193_s4, 4 }
  0x4a   : > { %s194_s6 = scalar_lea.sflag (!%p955_p0), [#allocation4], %s193_s4  ;;  %s197_s7 = scalar_lea.vmem (!%p955_p0), [#allocation3], %s443_s5 }
  0x50   : > { %678 = dma.done.wait (%p956_p5), %s194_s6, 256  }
  0x51   : > { %680 = vsyncadd (%p956_p5), %s194_s6, 4294967040  ;;  %s444_s29 = sshll.u32 %s193_s4, 2  ;;  %s203_s8 = scalar_lea.sflag [#allocation7], %s193_s4 }
  0x52   : > { %s206_s28 = scalar_lea.vmem [#allocation6], %s444_s29 }
  0x53   : > { %682 = dma.done.wait (%p956_p5), %s203_s8, 64  }
  0x54   : > { %684 = vsyncadd (%p956_p5), %s203_s8, 4294967232  ;;  %s249_s27 = smul.u32 12, %s712_s14  ;;  %v256_v0 = vlaneseq  ;;  %v728_v1 = vmov 0.0   ;;  %v250_v7 = vld [vmem:[%s197_s7] sm:$0xff]  ;;  %v251_v8 = vld [vmem:[%s197_s7 + $0x8] sm:$0xf] }
  0x55   : > { %247 = vst [vmem:[#allocation2 + $0x8] sm:$0xf] %v728_v1  ;;  %v252_v9 = vld [vmem:[%s206_s28] sm:$0x3]  ;;  %v253_v10 = vld [vmem:[%s206_s28 + $0x2] sm:$0x1] }
  0x56   : > { %v257_v2 = vshrl.u32 %v256_v0, 7  ;;  %v259_v3 = vstv %s249_s27  ;;  %vm254_vm3 = vnez %v252_v9  ;;  %v270_v11 = vmax.f32 %v250_v7, 1e-07  ;;  %s229_s21 = sand.u32 1, %s696_s10   ;;  %s447_s18 = sshll.u32 %s712_s14, 7 }
  0x57   : > { %vm255_vm5 = vnez %v253_v10  ;;  %v271_v12 = vmax.f32 %v251_v8, 1e-07  ;;  %v729_v14 = vmov 0   ;;  %vm305_vm12 = vcmask 1043456   ;;  %s445_s3 = sshll.u32 %s229_s21, 3  ;;  %s893_s23 = scalar_lea.hbm %s946_s2, %s447_s18 }
  0x58   : > { %v258_v4 = vadd.s32 8, %v257_v2  ;;  %v260_v5 = vadd.s32 %v259_v3, %v257_v2  ;;  %v272_v13 = vmin.f32 %v270_v11, 0.9999999  ;;  %s231_s12 = scalar_lea.vmem [#allocation8], %s445_s3  ;;  %s318_s30 = scalar_lea.sflag [#allocation5], %s229_s21 }
  0x59   : > { %v273_v16 = vmin.f32 %v271_v12, 0.9999999  ;;  %s331_s17 = sshll.u32 %s231_s12, 4  ;;  %p957_p13 = scmp.ne.s32.totalorder %s951_s25, 0  ;;  %s888_s17 = int_to_ptr.vmem [resolvable:$true] %s331_s17 }
  0x5a   : > { %v261_v6 = vadd.s32 %v259_v3, %v258_v4  ;;  %vm262_vm0 = vcmp.lt.s32.totalorder %v260_v5, 12  ;;  %s613_s4 = scalar_lea.vmem %s888_s17, 128  ;;  %s730_s5 = smov [#allocation8]  }
  0x5b   : > { %vm264_vm2 = vmpackc.low %vm262_vm0, %vm262_vm0  ;;  %p614_p2 = scmp.ne.s32.totalorder %s888_s17, %s613_s4  ;;  %s617_s14 = sshll.u32 %s730_s5, 4  ;;  %s618_s14 = int_to_ptr.vmem [resolvable:$false] %s617_s14 }
  0x5c   : > { %vm263_vm1 = vcmp.lt.s32.totalorder %v261_v6, 12  ;;  %vm265_vm4 = vmpackc.even %vm264_vm2, %vm264_vm2  ;;  %v287_v32 = vld [vmem:[#allocation2 + $0x8] sm:$0xf]  ;;  %s619_s6 = scalar_lea.vmem %s618_s14, 256  ;;  %p620_p11 = scmp.lt.s32.totalorder %s888_s17, %s618_s14 }
  0x5d   : > { %vm266_vm6 = vmpackc.low %vm263_vm1, %vm263_vm1  ;;  %p615_p9 = pnand %p614_p2, %p957_p13  ;;  %p621_p1 = scmp.lt.s32.totalorder %s619_s6, %s613_s4 }
  0x5e   : > { %vm267_vm7 = vmpackc.even %vm266_vm6, %vm266_vm6 }
  0x5f   : > { %vm268_vm8 = vmand %vm254_vm3, %vm265_vm4  ;;  %p616_p10 = pneg %p615_p9  ;;  %p622_p3 = por %p621_p1, %p620_p11 }
  0x60   : > { %vm269_vm9 = vmand %vm255_vm5, %vm267_vm7  ;;  %v274_v15 = vsel %vm268_vm8, 16843009, %v729_v14 }
  0x61   : > { %v275_v17 = vsel %vm269_vm9, 16843009, %v729_v14  ;;  %v276_v18 = vunpack.c.0.s8 %v274_v15  ;;  %p623_p7 = pnand %p622_p3, %p616_p10 }
  0x62   : > { %v277_v19 = vunpack.c.0.s8 %v275_v17 }
  0x63   : > { %vm278_vm10 = vcmp.ne.s32.totalorder %v276_v18, 0 }
  0x64   : > { %vm279_vm11 = vcmp.ne.s32.totalorder %v277_v19, 0  ;;  %v280_v20 = vsel %vm278_vm10, %v272_v13, 1.0 }
  0x65   : > { %v281_v21 = vsel %vm279_vm11, %v273_v16, 1.0  ;;  %549 = vlog2.f32 %v280_v20  ;;  %v282_v22 = vsub.f32 1.0, %v280_v20 }
  0x66   : > { %551 = vlog2.f32 %v281_v21  ;;  %v283_v23 = vsub.f32 1.0, %v281_v21 }
  0x67   : > { %v284_v26 = vmul.f32 %v282_v22, %v282_v22 }
  0x68   : > { %v285_v28 = vmul.f32 %v283_v23, %v283_v23 }
  0x6f   : > { %v550_v24 = vpop.eup %549 }
  0x70   : > { %v552_v25 = vpop.eup %551  ;;  %v289_v27 = vmul.f32 0.6931472, %v550_v24 }
  0x71   : > { %v291_v29 = vmul.f32 0.6931472, %v552_v25 }
  0x72   : > { %v292_v30 = vsub.f32 0.0, %v289_v27 }
  0x73   : > { %v293_v31 = vsub.f32 0.0, %v291_v29 }
  0x74   : > { %v294_v33 = vmul.f32 %v292_v30, %v284_v26 }
  0x75   : > { %v295_v34 = vmul.f32 %v293_v31, %v285_v28 }
  0x77   : > { %v297_v35 = vadd.f32 %v295_v34, %v287_v32 }
  0x79   : > { %299 = vst [vmem:[#allocation2 + $0x8] sm:$0xf] %v297_v35 }
  0x80   : > { %v304_v36 = vld [vmem:[#allocation2 + $0x8] sm:$0xf] }
  0x81   : > { %v306_v37 = vsel %vm305_vm12, %v304_v36, 0.0 }
  0x82   : > { %v307_v38 = vadd.f32 %v306_v37, %v294_v33 }
  0x84   : > { %v308_v39 = vrot.slane %v307_v38, 4 }
  0x86   : > { %v309_v40 = vadd.f32 %v308_v39, %v307_v38 }
  0x88   : > { %v310_v41 = vrot.slane %v309_v40, 2 }
  0x8a   : > { %v311_v42 = vadd.f32 %v310_v41, %v309_v40 }
  0x8c   : > { %v312_v43 = vrot.slane %v311_v42, 1 }
  0x8e   : > { %v313_v44 = vadd.f32 %v312_v43, %v311_v42 }
  0x90   : > { %314 = vadd.xlane.f32.xlu0 %v313_v44 }
 0x11d   : > { %v315_v45 = vpop.xlane.xlu0 %314 }
 0x11e   : > { %316 = vst [vmem:[%s231_s12] sm:$0xff] %v315_v45 }
 0x11f   : > { %626 = shalt.err (!%p623_p7)
}
 0x120   : > { %s627_s7 = scalar_lea.hbm %s893_s23, 128  ;;  %s631_s28 = scalar_lea.hbm %s946_s2, 256 }
 0x121   : > { %p628_p4 = scmp.ne.s32.totalorder %s893_s23, %s627_s7  ;;  %p632_p12 = scmp.lt.u32.totalorder %s893_s23, %s946_s2 }
 0x122   : > { %p633_p0 = scmp.lt.u32.totalorder %s631_s28, %s627_s7  ;;  %p635_p2 = scmp.lt.u32.totalorder %s627_s7, %s893_s23 }
 0x123   : > { %p629_p8 = pnand %p628_p4, %p957_p13 }
 0x124   : > { %p634_p5 = por %p633_p0, %p632_p12 }
 0x125   : > { %p630_p6 = pneg %p629_p8 }
 0x126   : > { %p636_p9 = por %p635_p2, %p634_p5 }
 0x128   : > { %p637_p10 = pnand %p636_p9, %p630_p6 }
 0x12a   : > { %640 = shalt.err (!%p637_p10)
}
 0x12b   : > { %456 = dma.vmem_to_hbm [thread:$0]  (%p957_p13), %s888_s17, 128, %s893_s23, %s318_s30  }
 0x12c PF: > { %s343_s3 = sand.u32 1, %s692_s9   ;;  %p958_p11 = scmp.ne.s32.totalorder %s952_s26, 0 }
 0x12d   : > { %p959_p1 = scmp.ge.s32.totalorder %s720_s16, 2  ;;  %s344_s12 = scalar_lea.sflag [#allocation5], %s343_s3 }
 0x12f   : > { %p466_p3 = pnand %p959_p1, %p958_p11 }
 0x131   : > { %686 = dma.done.wait (!%p466_p3), %s344_s12, 128  }
 0x132   : > { %688 = vsyncadd (!%p466_p3), %s344_s12, 4294967168  ;;  %s21_s16 = sadd.s32 1, %s720_s16   ;;  %s960_s9 = smov %s696_s10 }
 0x133   : > { %p18_p7 = scmp.ge.s32.totalorder %s21_s16, 4   ;;  %s961_s10 = smov %s700_s11 }
 0x134   : > { %s962_s11 = smov %s804_s24  ;;  %s963_s12 = smov %s708_s13 }
 0x135   : > { %s934_s13 = smov 0   ;;  %s964_s14 = smov %s716_s15 }
 0x136   : > { %s965_s15 = smov %s967_s19  ;;  %20 = sbr.rel (!%p18_p7) target bundleno = 9 (0x9), region = 94 }
 0x13d   :  { %349 = vsyncpa [#allocation4], 1 }
 0x13e   :  { %351 = vsyncpa [#allocation4 + $0x1], 1 }
 0x13f   :  { %352 = vsyncpa [#allocation7], 1 }
 0x140   :  { %354 = vsyncpa [#allocation7 + $0x1], 1 }
 0x141   :  { %355 = vsyncpa [#allocation5], 1 }
 0x142   :  { %357 = vsyncpa [#allocation5 + $0x1], 1 }

</bundles_post_ra>
